<compile_context>
chip_gen: v5e
topology: v5e:2x2
jax: 0.10.0
libtpu: 0.0.40
codegen_flags: <defaults>
</compile_context>

<pallas_src>
import functools

import jax
import jax.numpy as jnp
from jax.experimental import pallas as pl
from jax.experimental.pallas import tpu as pltpu

_LANE = 128
_SUBLANE_BF16 = 16  # bf16 packs two rows per sublane -> tile rows in multiples of 16


def _round_up(x, m):
    return ((x + m - 1) // m) * m


def _cdiv(a, b):
    return (a + b - 1) // b


def _tpu_config():
    """Per-generation VMEM budget / core count / batch-tile cap."""
    vmem, cores, tb_cap = 64 << 20, 1, 512  # conservative default
    try:
        kind = jax.devices()[0].device_kind.lower()
    except Exception:
        return {"vmem_bytes": vmem, "cores": cores, "tb_cap": tb_cap}
    if "v7" in kind:
        return {"vmem_bytes": 64 << 20, "cores": 2, "tb_cap": 512}
    if "v6" in kind or "v5 lite" in kind or "v5e" in kind or "v5lite" in kind:
        return {"vmem_bytes": 128 << 20, "cores": 1, "tb_cap": 1024}
    return {"vmem_bytes": vmem, "cores": cores, "tb_cap": tb_cap}


def _choose_tiling(B, zdim, H1, H2, D_pad):
    """Pick batch tile TB, padded batch, grid size and a vmem limit that fit the chip."""
    cfg = _tpu_config()
    # single-buffered (Buffered(1)) invariant operands
    weight_bytes = (zdim * H1 + H1 * H2 + H2 * D_pad) * 2 + 8 * H1 * 4 + D_pad * 4
    # per-row VMEM: double-buffered z (f32) + double-buffered out (f32)
    # + generous allowance for the f32/bf16 hidden temporaries inside the kernel.
    per_row = 2 * (zdim * 4 + D_pad * 4) + 4 * H1 * 4
    budget = int(cfg["vmem_bytes"] * 0.70) - weight_bytes
    tb_cap = max(_SUBLANE_BF16,
                 min(cfg["tb_cap"], (max(budget, 0) // per_row) // 16 * 16))
    # Load-balanced tile count; keep >=2 grid steps on 2-TC chips when B allows.
    num_tiles = max(_cdiv(B, tb_cap),
                    min(cfg["cores"], max(1, B // _SUBLANE_BF16)))
    TB = _round_up(_cdiv(B, num_tiles), _SUBLANE_BF16)
    B_pad = num_tiles * TB
    need = weight_bytes + per_row * TB + (4 << 20)
    vmem_limit = int(min(max(need, 32 << 20), int(cfg["vmem_bytes"] * 0.85)))
    return TB, B_pad, num_tiles, vmem_limit


def _layernorm(x, gamma, beta, eps=1e-5):
    # PyTorch LayerNorm: biased variance over last dim, eps inside sqrt.
    mean = jnp.mean(x, axis=-1, keepdims=True)
    var = jnp.mean((x - mean) ** 2, axis=-1, keepdims=True)
    inv = jax.lax.rsqrt(var + eps)
    return (x - mean) * inv * gamma + beta


def _gelu_exact(x):
    # nn.GELU() default = exact erf-based GELU.
    return 0.5 * x * (1.0 + jax.lax.erf(x * 0.7071067811865476))


def _decoder_kernel(z_ref, w1_ref, w2_ref, w5_ref, ln_ref, b5_ref, out_ref,
                    *, sig_start, sig_end, bern_start, bern_end):
    # ln_ref rows: 0=b1, 1=g1, 2=be1, 3=b2, 4=g2, 5=be2 (rows 6,7 padding).
    # body1: Linear -> LayerNorm -> GELU  (bf16 operands, f32 accumulation)
    z = z_ref[...].astype(w1_ref.dtype)  # in-kernel cast: z read once from HBM as f32
    h = jnp.dot(z, w1_ref[...], preferred_element_type=jnp.float32)
    h = h + ln_ref[0:1, :]
    h = _layernorm(h, ln_ref[1:2, :], ln_ref[2:3, :])
    h = _gelu_exact(h)

    # body2: Linear -> LayerNorm -> GELU
    h = jnp.dot(h.astype(w2_ref.dtype), w2_ref[...],
                preferred_element_type=jnp.float32)
    h = h + ln_ref[3:4, :]
    h = _layernorm(h, ln_ref[4:5, :], ln_ref[5:6, :])
    h = _gelu_exact(h)

    # body5: Linear only (columns already permuted to [mu|sigma|bern|cat]+pad)
    x = jnp.dot(h.astype(w5_ref.dtype), w5_ref[...],
                preferred_element_type=jnp.float32)
    x = x + b5_ref[...]

    # Column-range post-processing on the permuted, lane-dense layout.
    col = jax.lax.broadcasted_iota(jnp.int32, x.shape, 1)
    sig_mask = (col >= sig_start) & (col < sig_end)
    bern_mask = (col >= bern_start) & (col < bern_end)
    # exp only ever sees the sigma columns (others replaced by 0 -> stays finite).
    x_exp = jnp.exp(jnp.where(sig_mask, x, 0.0))
    x_sig = jax.nn.sigmoid(x)
    out = jnp.where(sig_mask, x_exp, x)
    out = jnp.where(bern_mask, x_sig, out)
    out_ref[...] = out


def _invariant_spec(shape):
    """Grid-invariant operand: stays VMEM-resident; single-buffered when supported."""
    if hasattr(pl, "Buffered"):
        try:
            return pl.BlockSpec(shape, lambda i: (0, 0), pipeline_mode=pl.Buffered(1))
        except TypeError:
            pass
    return pl.BlockSpec(shape, lambda i: (0, 0))


@functools.partial(
    jax.jit,
    static_argnames=("sig_start", "sig_end", "bern_start", "bern_end"))
def _decoder_pallas(z, w1, w2, w5, ln_vecs, b5, *,
                    sig_start, sig_end, bern_start, bern_end):
    B, zdim = z.shape
    H1 = w1.shape[1]
    H2 = w2.shape[1]
    D_pad = w5.shape[1]

    TB, B_pad, num_tiles, vmem_limit = _choose_tiling(B, zdim, H1, H2, D_pad)
    if B_pad != B:
        z = jnp.pad(z, ((0, B_pad - B), (0, 0)))  # only when B is not tile-aligned

    kernel = functools.partial(
        _decoder_kernel,
        sig_start=sig_start, sig_end=sig_end,
        bern_start=bern_start, bern_end=bern_end)

    out = pl.pallas_call(
        kernel,
        out_shape=jax.ShapeDtypeStruct((B_pad, D_pad), jnp.float32),
        grid=(num_tiles,),
        in_specs=[
            pl.BlockSpec((TB, zdim), lambda i: (i, 0)),  # z (f32, batch tiled)
            _invariant_spec((zdim, H1)),                 # w1 (bf16)
            _invariant_spec((H1, H2)),                   # w2 (bf16)
            _invariant_spec((H2, D_pad)),                # w5 (bf16, permuted+padded)
            _invariant_spec((8, H1)),                    # packed b/gamma/beta (f32)
            _invariant_spec((1, D_pad)),                 # b5 (f32, permuted+padded)
        ],
        out_specs=pl.BlockSpec((TB, D_pad), lambda i: (i, 0)),  # lane-dense f32
        compiler_params=pltpu.CompilerParams(
            dimension_semantics=("parallel",),
            vmem_limit_bytes=vmem_limit,
        ),
    )(z, w1, w2, w5, ln_vecs, b5)

    return out if B_pad == B else out[:B]


def prepare_decoder_params(params, feature_type_dict, *, weight_dtype=jnp.bfloat16):
    """One-time offline prep: permute/pad the final projection columns so the
    kernel output is [mu | sigma | bernoulli | categorical | zero-pad] and
    lane-dense, pack the 6 bias/gamma/beta vectors, cast matmul weights to bf16."""
    real_param = [tuple(v) for v in feature_type_dict["real_param"]]
    binary_param = [tuple(v) for v in feature_type_dict["binary_param"]]
    categorical_param = [tuple(v) for v in feature_type_dict["categorical_param"]]
    n_real = len(feature_type_dict["real_data"])

    # The PyTorch forward only reads column val[0] of each binary slice.
    for (s, e) in binary_param:
        assert e == s + 1, "binary_param slices are expected to be single-column"

    # Replicate torch.cat(real slices) then torch.split(.., n_real) ordering.
    gauss_cols = [c for (s, e) in real_param for c in range(s, e)]
    mu_cols = gauss_cols[:n_real]
    sigma_cols = gauss_cols[n_real:2 * n_real]
    bern_cols = [s for (s, _) in binary_param]
    cat_cols = [c for (s, e) in categorical_param for c in range(s, e)]
    perm = mu_cols + sigma_cols + bern_cols + cat_cols

    n_mu, n_sigma = len(mu_cols), len(sigma_cols)
    n_bern, n_cat = len(bern_cols), len(cat_cols)
    n_total = len(perm)
    d_pad = _round_up(max(n_total, 1), _LANE)

    idx = jnp.array(perm, dtype=jnp.int32)
    w5 = jnp.pad(params["w5"][:, idx], ((0, 0), (0, d_pad - n_total)))
    b5 = jnp.pad(params["b5"][:, idx], ((0, 0), (0, d_pad - n_total)))

    H1 = params["w1"].shape[1]
    H2 = params["w2"].shape[1]
    assert H1 == H2, "packed-vector path assumes body1/body2 share the hidden width"
    ln_vecs = jnp.zeros((8, H1), jnp.float32)
    ln_vecs = ln_vecs.at[0].set(params["b1"][0])
    ln_vecs = ln_vecs.at[1].set(params["g1"][0])
    ln_vecs = ln_vecs.at[2].set(params["be1"][0])
    ln_vecs = ln_vecs.at[3].set(params["b2"][0])
    ln_vecs = ln_vecs.at[4].set(params["g2"][0])
    ln_vecs = ln_vecs.at[5].set(params["be2"][0])

    prepared = {
        "w1": params["w1"].astype(weight_dtype),
        "w2": params["w2"].astype(weight_dtype),
        "w5": w5.astype(weight_dtype),
        "ln_vecs": ln_vecs,
        "b5": b5.astype(jnp.float32),
    }
    meta = {
        "n_mu": n_mu,
        "sig_start": n_mu,
        "sig_end": n_mu + n_sigma,
        "bern_start": n_mu + n_sigma,
        "bern_end": n_mu + n_sigma + n_bern,
        "cat_end": n_mu + n_sigma + n_bern + n_cat,
    }
    return prepared, meta


def decoder_forward(z, prepared, meta):
    out = _decoder_pallas(
        z, prepared["w1"], prepared["w2"], prepared["w5"],
        prepared["ln_vecs"], prepared["b5"],
        sig_start=meta["sig_start"], sig_end=meta["sig_end"],
        bern_start=meta["bern_start"], bern_end=meta["bern_end"])
    mu = out[:, :meta["n_mu"]]
    std = out[:, meta["sig_start"]:meta["sig_end"]]     # exp already applied in kernel
    bern = out[:, meta["bern_start"]:meta["bern_end"]]  # sigmoid already applied
    cat = out[:, meta["bern_end"]:meta["cat_end"]]
    return mu, std, bern, cat


def init_params(key, zdim, hidden, output_dim):
    """Deterministic init mirroring PyTorch Linear defaults; LayerNorm = (ones, zeros).
    Linear weights stored transposed vs PyTorch: (in_dim, out_dim)."""
    def linear(k, in_dim, out_dim):
        kw, kb = jax.random.split(k)
        bound = 1.0 / jnp.sqrt(jnp.float32(in_dim))
        w = jax.random.uniform(kw, (in_dim, out_dim), jnp.float32, -bound, bound)
        b = jax.random.uniform(kb, (1, out_dim), jnp.float32, -bound, bound)
        return w, b

    k1, k2, k5 = jax.random.split(key, 3)
    w1, b1 = linear(k1, zdim, hidden)
    w2, b2 = linear(k2, hidden, hidden)
    w5, b5 = linear(k5, hidden, output_dim)
    return {
        "w1": w1, "b1": b1,
        "g1": jnp.ones((1, hidden), jnp.float32),
        "be1": jnp.zeros((1, hidden), jnp.float32),
        "w2": w2, "b2": b2,
        "g2": jnp.ones((1, hidden), jnp.float32),
        "be2": jnp.zeros((1, hidden), jnp.float32),
        "w5": w5, "b5": b5,
    }


def _reference(z, params, ftd):
    """Pure-JAX f32 reference matching the PyTorch forward."""
    def ln(x, g, b):
        m = x.mean(-1, keepdims=True)
        v = ((x - m) ** 2).mean(-1, keepdims=True)
        return (x - m) * jax.lax.rsqrt(v + 1e-5) * g + b

    h = _gelu_exact(ln(z @ params["w1"] + params["b1"], params["g1"], params["be1"]))
    h = _gelu_exact(ln(h @ params["w2"] + params["b2"], params["g2"], params["be2"]))
    x = h @ params["w5"] + params["b5"]
    gauss = jnp.concatenate([x[:, s:e] for s, e in ftd["real_param"]], 1)
    n = len(ftd["real_data"])
    mu = gauss[:, :n]
    std = jnp.exp(gauss[:, n:2 * n])
    bern = jnp.concatenate(
        [jax.nn.sigmoid(x[:, s:s + 1]) for s, _ in ftd["binary_param"]], 1)
    cat = jnp.concatenate([x[:, s:e] for s, e in ftd["categorical_param"]], 1)
    return mu, std, bern, cat


if __name__ == "__main__":
    # Config (the parts of config['generate']['decoder'] that forward uses):
    #   arch = [[32], [32, 32], [32, 32], [32, 32], [32, output_dim]]
    #   bNorm = [32, 32, 0, 0, 0]   relu = [1, 1, 0, 0, 0]   dropout = [0]*5
    zdim, hidden, output_dim = 16, 32, 16
    batch = 8

    feature_type_dict = {
        "real_param": [(0, 4), (4, 8)],          # 8 gaussian-param cols (mu | log-sigma)
        "real_data": ["r0", "r1", "r2", "r3"],   # 4 real features
        "binary_param": [(8, 9), (9, 10)],       # 2 bernoulli logits
        "categorical_param": [(10, 13), (13, 16)],  # two categoricals, 3 classes each
    }

    key = jax.random.PRNGKey(0)
    kp, kz = jax.random.split(key)
    params = init_params(kp, zdim, hidden, output_dim)
    z = jax.random.normal(kz, (batch, zdim), jnp.float32)

    prepared, meta = prepare_decoder_params(params, feature_type_dict)
    mu, std, bern, cat = decoder_forward(z, prepared, meta)
    jax.block_until_ready((mu, std, bern, cat))

    assert mu.shape == (batch, 4)
    assert std.shape == (batch, 4)
    assert bern.shape == (batch, 2)
    assert cat.shape == (batch, 6)
    assert bool(jnp.all(std > 0)) and bool(jnp.all((bern > 0) & (bern < 1)))

    # Correctness vs f32 reference (bf16 matmul operands -> loose tolerance).
    r_mu, r_std, r_bern, r_cat = _reference(z, params, feature_type_dict)
    for got, ref in ((mu, r_mu), (std, r_std), (bern, r_bern), (cat, r_cat)):
        err = float(jnp.max(jnp.abs(got - ref)))
        assert jnp.allclose(got, ref, atol=5e-2, rtol=5e-2), err

    print("KERNEL_OK")
</pallas_src>

<mosaic_0001>
module attributes {stable_mosaic.version = 11 : i64} {
  func.func @_decoder_kernel(%arg0: i32, %arg1: memref<16x16xf32, #tpu.memory_space<vmem>>, %arg2: memref<16x32xbf16, #tpu.memory_space<vmem>>, %arg3: memref<32x32xbf16, #tpu.memory_space<vmem>>, %arg4: memref<32x128xbf16, #tpu.memory_space<vmem>>, %arg5: memref<8x32xf32, #tpu.memory_space<vmem>>, %arg6: memref<1x128xf32, #tpu.memory_space<vmem>>, %arg7: memref<16x128xf32, #tpu.memory_space<vmem>>) attributes {dimension_semantics = [#tpu.dimension_semantics<parallel>], iteration_bounds = array<i64: 1>, scalar_prefetch = 0 : i64, scratch_operands = 0 : i64, tpu.core_type = #tpu.core_type<tc>, window_params = [{transform_indices = @transform_0, window_bounds = array<i64: 16, 16>}, {pipeline_mode = #tpu.pipeline_mode<synchronous>, transform_indices = @transform_1, window_bounds = array<i64: 16, 32>}, {pipeline_mode = #tpu.pipeline_mode<synchronous>, transform_indices = @transform_2, window_bounds = array<i64: 32, 32>}, {pipeline_mode = #tpu.pipeline_mode<synchronous>, transform_indices = @transform_3, window_bounds = array<i64: 32, 128>}, {pipeline_mode = #tpu.pipeline_mode<synchronous>, transform_indices = @transform_4, window_bounds = array<i64: 8, 32>}, {pipeline_mode = #tpu.pipeline_mode<synchronous>, transform_indices = @transform_5, window_bounds = array<i64: 1, 128>}, {transform_indices = @transform_6, window_bounds = array<i64: 16, 128>}]} {
    %c0 = arith.constant 0 : index
    %c0_0 = arith.constant 0 : index
    %0 = vector.load %arg1[%c0, %c0_0] : memref<16x16xf32, #tpu.memory_space<vmem>>, vector<16x16xf32>
    %1 = arith.truncf %0 : vector<16x16xf32> to vector<16x16xbf16>
    %c0_1 = arith.constant 0 : index
    %c0_2 = arith.constant 0 : index
    %2 = vector.load %arg2[%c0_1, %c0_2] : memref<16x32xbf16, #tpu.memory_space<vmem>>, vector<16x32xbf16>
    %cst = arith.constant dense<0.000000e+00> : vector<16x32xf32>
    %3 = tpu.matmul %1, %2, %cst {dimension_numbers = #tpu.dot_dimension_numbers<[1], [0], [0], [1], [0, 0, 1, 1], [], []>} : vector<16x16xbf16>, vector<16x32xbf16>, vector<16x32xf32> -> vector<16x32xf32>
    %c0_3 = arith.constant 0 : index
    %c0_4 = arith.constant 0 : index
    %4 = vector.load %arg5[%c0_3, %c0_4] : memref<8x32xf32, #tpu.memory_space<vmem>>, vector<1x32xf32>
    %5 = vector.broadcast %4 : vector<1x32xf32> to vector<16x32xf32>
    %6 = arith.addf %3, %5 : vector<16x32xf32>
    %c1 = arith.constant 1 : index
    %c0_5 = arith.constant 0 : index
    %7 = vector.load %arg5[%c1, %c0_5] : memref<8x32xf32, #tpu.memory_space<vmem>>, vector<1x32xf32>
    %c2 = arith.constant 2 : index
    %c0_6 = arith.constant 0 : index
    %8 = vector.load %arg5[%c2, %c0_6] : memref<8x32xf32, #tpu.memory_space<vmem>>, vector<1x32xf32>
    %cst_7 = arith.constant dense<0.000000e+00> : vector<16xf32>
    %9 = vector.multi_reduction <add>, %6, %cst_7 [1] : vector<16x32xf32> to vector<16xf32>
    %10 = vector.shape_cast %9 : vector<16xf32> to vector<16x1xf32>
    %cst_8 = arith.constant 3.200000e+01 : f32
    %11 = vector.broadcast %cst_8 : f32 to vector<16x1xf32>
    %12 = arith.divf %10, %11 : vector<16x1xf32>
    %13 = vector.broadcast %12 : vector<16x1xf32> to vector<16x32xf32>
    %14 = arith.subf %6, %13 : vector<16x32xf32>
    %15 = arith.mulf %14, %14 : vector<16x32xf32>
    %cst_9 = arith.constant dense<0.000000e+00> : vector<16xf32>
    %16 = vector.multi_reduction <add>, %15, %cst_9 [1] : vector<16x32xf32> to vector<16xf32>
    %17 = vector.shape_cast %16 : vector<16xf32> to vector<16x1xf32>
    %cst_10 = arith.constant 3.200000e+01 : f32
    %18 = vector.broadcast %cst_10 : f32 to vector<16x1xf32>
    %19 = arith.divf %17, %18 : vector<16x1xf32>
    %cst_11 = arith.constant 9.99999974E-6 : f32
    %20 = vector.broadcast %cst_11 : f32 to vector<16x1xf32>
    %21 = arith.addf %19, %20 : vector<16x1xf32>
    %22 = math.rsqrt %21 : vector<16x1xf32>
    %23 = vector.broadcast %12 : vector<16x1xf32> to vector<16x32xf32>
    %24 = arith.subf %6, %23 : vector<16x32xf32>
    %25 = vector.broadcast %22 : vector<16x1xf32> to vector<16x32xf32>
    %26 = arith.mulf %24, %25 : vector<16x32xf32>
    %27 = vector.broadcast %7 : vector<1x32xf32> to vector<16x32xf32>
    %28 = arith.mulf %26, %27 : vector<16x32xf32>
    %29 = vector.broadcast %8 : vector<1x32xf32> to vector<16x32xf32>
    %30 = arith.addf %28, %29 : vector<16x32xf32>
    %cst_12 = arith.constant 5.000000e-01 : f32
    %31 = vector.broadcast %cst_12 : f32 to vector<16x32xf32>
    %32 = arith.mulf %31, %30 : vector<16x32xf32>
    %cst_13 = arith.constant 0.707106769 : f32
    %33 = vector.broadcast %cst_13 : f32 to vector<16x32xf32>
    %34 = arith.mulf %30, %33 : vector<16x32xf32>
    %35 = math.erf %34 : vector<16x32xf32>
    %cst_14 = arith.constant 1.000000e+00 : f32
    %36 = vector.broadcast %cst_14 : f32 to vector<16x32xf32>
    %37 = arith.addf %36, %35 : vector<16x32xf32>
    %38 = arith.mulf %32, %37 : vector<16x32xf32>
    %39 = arith.truncf %38 : vector<16x32xf32> to vector<16x32xbf16>
    %c0_15 = arith.constant 0 : index
    %c0_16 = arith.constant 0 : index
    %40 = vector.load %arg3[%c0_15, %c0_16] : memref<32x32xbf16, #tpu.memory_space<vmem>>, vector<32x32xbf16>
    %cst_17 = arith.constant dense<0.000000e+00> : vector<16x32xf32>
    %41 = tpu.matmul %39, %40, %cst_17 {dimension_numbers = #tpu.dot_dimension_numbers<[1], [0], [0], [1], [0, 0, 1, 1], [], []>} : vector<16x32xbf16>, vector<32x32xbf16>, vector<16x32xf32> -> vector<16x32xf32>
    %c3 = arith.constant 3 : index
    %c0_18 = arith.constant 0 : index
    %42 = vector.load %arg5[%c3, %c0_18] : memref<8x32xf32, #tpu.memory_space<vmem>>, vector<1x32xf32>
    %43 = vector.broadcast %42 : vector<1x32xf32> to vector<16x32xf32>
    %44 = arith.addf %41, %43 : vector<16x32xf32>
    %c4 = arith.constant 4 : index
    %c0_19 = arith.constant 0 : index
    %45 = vector.load %arg5[%c4, %c0_19] : memref<8x32xf32, #tpu.memory_space<vmem>>, vector<1x32xf32>
    %c5 = arith.constant 5 : index
    %c0_20 = arith.constant 0 : index
    %46 = vector.load %arg5[%c5, %c0_20] : memref<8x32xf32, #tpu.memory_space<vmem>>, vector<1x32xf32>
    %cst_21 = arith.constant dense<0.000000e+00> : vector<16xf32>
    %47 = vector.multi_reduction <add>, %44, %cst_21 [1] : vector<16x32xf32> to vector<16xf32>
    %48 = vector.shape_cast %47 : vector<16xf32> to vector<16x1xf32>
    %cst_22 = arith.constant 3.200000e+01 : f32
    %49 = vector.broadcast %cst_22 : f32 to vector<16x1xf32>
    %50 = arith.divf %48, %49 : vector<16x1xf32>
    %51 = vector.broadcast %50 : vector<16x1xf32> to vector<16x32xf32>
    %52 = arith.subf %44, %51 : vector<16x32xf32>
    %53 = arith.mulf %52, %52 : vector<16x32xf32>
    %cst_23 = arith.constant dense<0.000000e+00> : vector<16xf32>
    %54 = vector.multi_reduction <add>, %53, %cst_23 [1] : vector<16x32xf32> to vector<16xf32>
    %55 = vector.shape_cast %54 : vector<16xf32> to vector<16x1xf32>
    %cst_24 = arith.constant 3.200000e+01 : f32
    %56 = vector.broadcast %cst_24 : f32 to vector<16x1xf32>
    %57 = arith.divf %55, %56 : vector<16x1xf32>
    %cst_25 = arith.constant 9.99999974E-6 : f32
    %58 = vector.broadcast %cst_25 : f32 to vector<16x1xf32>
    %59 = arith.addf %57, %58 : vector<16x1xf32>
    %60 = math.rsqrt %59 : vector<16x1xf32>
    %61 = vector.broadcast %50 : vector<16x1xf32> to vector<16x32xf32>
    %62 = arith.subf %44, %61 : vector<16x32xf32>
    %63 = vector.broadcast %60 : vector<16x1xf32> to vector<16x32xf32>
    %64 = arith.mulf %62, %63 : vector<16x32xf32>
    %65 = vector.broadcast %45 : vector<1x32xf32> to vector<16x32xf32>
    %66 = arith.mulf %64, %65 : vector<16x32xf32>
    %67 = vector.broadcast %46 : vector<1x32xf32> to vector<16x32xf32>
    %68 = arith.addf %66, %67 : vector<16x32xf32>
    %cst_26 = arith.constant 5.000000e-01 : f32
    %69 = vector.broadcast %cst_26 : f32 to vector<16x32xf32>
    %70 = arith.mulf %69, %68 : vector<16x32xf32>
    %cst_27 = arith.constant 0.707106769 : f32
    %71 = vector.broadcast %cst_27 : f32 to vector<16x32xf32>
    %72 = arith.mulf %68, %71 : vector<16x32xf32>
    %73 = math.erf %72 : vector<16x32xf32>
    %cst_28 = arith.constant 1.000000e+00 : f32
    %74 = vector.broadcast %cst_28 : f32 to vector<16x32xf32>
    %75 = arith.addf %74, %73 : vector<16x32xf32>
    %76 = arith.mulf %70, %75 : vector<16x32xf32>
    %77 = arith.truncf %76 : vector<16x32xf32> to vector<16x32xbf16>
    %c0_29 = arith.constant 0 : index
    %c0_30 = arith.constant 0 : index
    %78 = vector.load %arg4[%c0_29, %c0_30] : memref<32x128xbf16, #tpu.memory_space<vmem>>, vector<32x128xbf16>
    %cst_31 = arith.constant dense<0.000000e+00> : vector<16x128xf32>
    %79 = tpu.matmul %77, %78, %cst_31 {dimension_numbers = #tpu.dot_dimension_numbers<[1], [0], [0], [1], [0, 0, 1, 1], [], []>} : vector<16x32xbf16>, vector<32x128xbf16>, vector<16x128xf32> -> vector<16x128xf32>
    %c0_32 = arith.constant 0 : index
    %c0_33 = arith.constant 0 : index
    %80 = vector.load %arg6[%c0_32, %c0_33] : memref<1x128xf32, #tpu.memory_space<vmem>>, vector<1x128xf32>
    %81 = vector.broadcast %80 : vector<1x128xf32> to vector<16x128xf32>
    %82 = arith.addf %79, %81 : vector<16x128xf32>
    %83 = tpu.iota {dimensions = array<i32: 1>} : vector<16x128xi32>
    %c4_i32 = arith.constant 4 : i32
    %84 = vector.broadcast %c4_i32 : i32 to vector<16x128xi32>
    %85 = arith.cmpi sge, %83, %84 : vector<16x128xi32>
    %c8_i32 = arith.constant 8 : i32
    %86 = vector.broadcast %c8_i32 : i32 to vector<16x128xi32>
    %87 = arith.cmpi slt, %83, %86 : vector<16x128xi32>
    %88 = arith.andi %85, %87 : vector<16x128xi1>
    %c8_i32_34 = arith.constant 8 : i32
    %89 = vector.broadcast %c8_i32_34 : i32 to vector<16x128xi32>
    %90 = arith.cmpi sge, %83, %89 : vector<16x128xi32>
    %c10_i32 = arith.constant 10 : i32
    %91 = vector.broadcast %c10_i32 : i32 to vector<16x128xi32>
    %92 = arith.cmpi slt, %83, %91 : vector<16x128xi32>
    %93 = arith.andi %90, %92 : vector<16x128xi1>
    %cst_35 = arith.constant 0.000000e+00 : f32
    %94 = vector.broadcast %cst_35 : f32 to vector<16x128xf32>
    %95 = arith.select %88, %82, %94 : vector<16x128xi1>, vector<16x128xf32>
    %96 = math.exp %95 : vector<16x128xf32>
    %97 = arith.negf %82 : vector<16x128xf32>
    %98 = math.exp %97 : vector<16x128xf32>
    %cst_36 = arith.constant 1.000000e+00 : f32
    %99 = vector.broadcast %cst_36 : f32 to vector<16x128xf32>
    %100 = arith.addf %99, %98 : vector<16x128xf32>
    %101 = arith.divf %99, %100 : vector<16x128xf32>
    %102 = arith.select %88, %96, %82 : vector<16x128xi1>, vector<16x128xf32>
    %103 = arith.select %93, %101, %102 : vector<16x128xi1>, vector<16x128xf32>
    %c0_37 = arith.constant 0 : index
    %c0_38 = arith.constant 0 : index
    %104 = vector.load %arg7[%c0_37, %c0_38] : memref<16x128xf32, #tpu.memory_space<vmem>>, vector<16x128xf32>
    tpu.vector_store %arg7[%c0_37, %c0_38], %103 {strides = array<i32>} : memref<16x128xf32, #tpu.memory_space<vmem>>, vector<16x128xf32>,
    return
  }
  func.func @transform_0(%arg0: i32) -> (i32, i32) {
    %c0_i32 = arith.constant 0 : i32
    %c0_i32_0 = arith.constant 0 : i32
    return %arg0, %c0_i32 : i32, i32
  }
  func.func @transform_1(%arg0: i32) -> (i32, i32) {
    %c0_i32 = arith.constant 0 : i32
    %c0_i32_0 = arith.constant 0 : i32
    %c0_i32_1 = arith.constant 0 : i32
    return %c0_i32, %c0_i32_0 : i32, i32
  }
  func.func @transform_2(%arg0: i32) -> (i32, i32) {
    %c0_i32 = arith.constant 0 : i32
    %c0_i32_0 = arith.constant 0 : i32
    %c0_i32_1 = arith.constant 0 : i32
    return %c0_i32, %c0_i32_0 : i32, i32
  }
  func.func @transform_3(%arg0: i32) -> (i32, i32) {
    %c0_i32 = arith.constant 0 : i32
    %c0_i32_0 = arith.constant 0 : i32
    %c0_i32_1 = arith.constant 0 : i32
    return %c0_i32, %c0_i32_0 : i32, i32
  }
  func.func @transform_4(%arg0: i32) -> (i32, i32) {
    %c0_i32 = arith.constant 0 : i32
    %c0_i32_0 = arith.constant 0 : i32
    %c0_i32_1 = arith.constant 0 : i32
    return %c0_i32, %c0_i32_0 : i32, i32
  }
  func.func @transform_5(%arg0: i32) -> (i32, i32) {
    %c0_i32 = arith.constant 0 : i32
    %c0_i32_0 = arith.constant 0 : i32
    %c0_i32_1 = arith.constant 0 : i32
    return %c0_i32, %c0_i32_0 : i32, i32
  }
  func.func @transform_6(%arg0: i32) -> (i32, i32) {
    %c0_i32 = arith.constant 0 : i32
    %c0_i32_0 = arith.constant 0 : i32
    return %arg0, %c0_i32 : i32, i32
  }
}

</mosaic_0001>

<bundles_post_ra>
// kernel: _decoder_pallas.1
= control target key start
LH: loop header
LB: loop body
LE: loop exit
PB: predicated region body
PF: predicated region fallthrough
CT: control target
= control target key end

     0   :  { %11 = vsyncpa [#allocation3], 0  ;;  %s785_s0 = inlined_call_operand.vmem [shape: f32[16,16], index: 0, kind: input, shape index: {}]   ;;  %s786_s1 = inlined_call_operand.vmem [shape: bf16[16,32], index: 1, kind: input, shape index: {}]   ;;  %s787_s2 = inlined_call_operand.vmem [shape: bf16[32,32], index: 2, kind: input, shape index: {}]   ;;  %s788_s3 = inlined_call_operand.hbm [shape: bf16[32,128], index: 3, kind: input, shape index: {}]   ;;  %s789_s4 = inlined_call_operand.hbm [shape: f32[8,32], index: 4, kind: input, shape index: {}]   ;;  %s790_s5 = inlined_call_operand.vmem [shape: f32[1,128], index: 5, kind: input, shape index: {}]   ;;  %s791_s6 = inlined_call_operand.vmem [shape: f32[16,128], index: 6, kind: output, shape index: {}]  }
   0x1   :  { %s23_s23 = sshll.u32 %s788_s3, 4  ;;  %s24_s23 = int_to_ptr.hbm [resolvable:$true] %s23_s23 }
   0x2   :  { %12 = vsyncpa [#allocation5], 0  ;;  %s639_s24 = smov [#allocation2]   ;;  %s37_s28 = sshll.u32 %s789_s4, 4  ;;  %s38_s28 = int_to_ptr.hbm [resolvable:$true] %s37_s28 }
   0x3   :  { %s25_s25 = sshll.u32 %s639_s24, 4  ;;  %s640_s29 = smov 64   ;;  %s26_s25 = int_to_ptr.vmem [resolvable:$true] %s25_s25 }
   0x4   :  { %s641_s30 = smov 4   ;;  %s642_s7 = smov [#allocation4]  }
   0x5   :  { %31 = dma.hbm_to_vmem [thread:$0]  %s24_s23, 256, %s26_s25, [#allocation3], %s640_s29, %s640_s29, %s641_s30  }
   0x6   :  { %s39_s8 = sshll.u32 %s642_s7, 4  ;;  %s40_s8 = int_to_ptr.vmem [resolvable:$true] %s39_s8 }
   0x7   :  { %42 = dma.hbm_to_vmem [thread:$0]  %s38_s28, 128, %s40_s8, [#allocation5]  }
   0x8   :  { %635 = dma.done.wait [#allocation3], 256  }
   0x9   :  { %636 = vsyncadd [#allocation3], 4294967040 }
   0xa   :  { %637 = dma.done.wait [#allocation5], 128  }
   0xb   :  { %638 = vsyncadd [#allocation5], 4294967168  ;;  %v540_v0 = vld [vmem:[%s786_s1] sm:$0xff]  ;;  %v55_v2 = vld [vmem:[%s785_s0 + $0x8] sm:$0xff]  ;;  %vm67_vm0 = vcmask 130048   ;;  %vm87_vm1 = vcmask 261120  }
   0xc   :  { %v54_v1 = vld [vmem:[%s785_s0] sm:$0xff]  ;;  %78 = vmatpush.bf16.msra.mxu0 %v540_v0  ;;  %v550_v4 = vld [vmem:[#allocation4] ss:$0 sm:$0xff]  ;;  %v643_v11 = vmov 32.0   ;;  %v542_v30 = vld [vmem:[%s787_s2 + $0x8] sm:$0xff] }
   0xd   :  { %v56_v3 = vpack.c.bf16 %v55_v2, %v54_v1  ;;  %557 = vrcp.f32 %v643_v11  ;;  %261 = vmatpush.bf16.msra.mxu1 %v542_v30  ;;  %v541_v32 = vld [vmem:[%s787_s2] sm:$0xff]  ;;  %v551_v44 = vld [vmem:[#allocation4 + $0x1] ss:$0 sm:$0xff]  ;;  %v552_v48 = vld [vmem:[#allocation4 + $0x2] ss:$0 sm:$0xff] }
   0xf   :  { %515 = vmatmul.msk.bf16.vlgmr.msra.gmra.mxu0 %vm67_vm0, %v56_v3 }
  0x11   :  { %262 = vmatpush.bf16.msra.mxu1 %v541_v32 }
  0x13   :  { %v558_v12 = vpop.eup %557 }
  0x14   :  { %v95_v13 = vmul.f32 32.0, %v558_v12  ;;  %vm99_vm2 = vweird.f32 %v558_v12 }
  0x16   :  { %v96_v14 = vsub.f32 1.0, %v95_v13 }
  0x18   :  { %v97_v15 = vmul.f32 %v558_v12, %v96_v14 }
  0x1a   :  { %v98_v16 = vadd.f32 %v558_v12, %v97_v15 }
  0x1c   :  { %v696_v17 = vsel %vm99_vm2, %v558_v12, %v98_v16 }
  0x8c   :  { %v80_v5 = vpop.f32.mrf.mxu0 }
  0x8d   :  { %v81_v6 = vadd.f32 %v550_v4, %v80_v5 }
  0x8f   :  { %v88_v7 = vsel %vm87_vm1, %v81_v6, 0.0 }
  0x90   :  { %89 = vadd.xlane.f32.xlu0 %v88_v7 }
  0x94   :  { %v82_v8 = vpop.f32.mrf.mxu0 }
  0x95   :  { %v83_v9 = vadd.f32 %v550_v4, %v82_v8 }
  0x97   :  { %v91_v10 = vsel %vm87_vm1, %v83_v9, 0.0 }
  0x98   :  { %92 = vadd.xlane.f32.xlu0 %v91_v10 }
 0x103   :  { %v90_v18 = vpop.xlane.xlu0 %89 }
 0x104   :  { %v101_v19 = vmul.f32 %v696_v17, %v90_v18 }
 0x106   :  { %v103_v20 = vsub.f32 %v81_v6, %v101_v19 }
 0x108   :  { %v105_v21 = vmul.f32 %v103_v20, %v103_v20 }
 0x10a   :  { %v107_v22 = vsel %vm87_vm1, %v105_v21, 0.0 }
 0x10b   :  { %108 = vadd.xlane.f32.xlu1 %v107_v22  ;;  %v93_v23 = vpop.xlane.xlu0 %92 }
 0x10c   :  { %v102_v24 = vmul.f32 %v696_v17, %v93_v23 }
 0x10e   :  { %v104_v25 = vsub.f32 %v83_v9, %v102_v24 }
 0x110   :  { %v106_v26 = vmul.f32 %v104_v25, %v104_v25 }
 0x112   :  { %v110_v27 = vsel %vm87_vm1, %v106_v26, 0.0 }
 0x113   :  { %111 = vadd.xlane.f32.xlu1 %v110_v27 }
 0x17e   :  { %v109_v28 = vpop.xlane.xlu1 %108 }
 0x17f   :  { %v113_v29 = vmul.f32 %v109_v28, %v696_v17 }
 0x181   :  { %v115_v31 = vadd.f32 1e-05, %v113_v29 }
 0x183   :  { %559 = vrsqrt.f32 %v115_v31  ;;  %vm123_vm4 = vweird.f32 %v115_v31 }
 0x186   :  { %v112_v33 = vpop.xlane.xlu1 %111 }
 0x187   :  { %v114_v34 = vmul.f32 %v112_v33, %v696_v17 }
 0x189   :  { %v560_v35 = vpop.eup %559  ;;  %v116_v36 = vadd.f32 1e-05, %v114_v34 }
 0x18a   :  { %v118_v37 = vmul.f32 %v560_v35, %v115_v31  ;;  %vm124_vm3 = vweird.f32 %v560_v35 }
 0x18b   :  { %561 = vrsqrt.f32 %v116_v36  ;;  %vm125_vm5 = vmor %vm123_vm4, %vm124_vm3  ;;  %vm133_vm7 = vweird.f32 %v116_v36 }
 0x18c   :  { %v119_v38 = vmul.f32 %v560_v35, %v118_v37 }
 0x18e   :  { %v120_v39 = vmul.f32 0.5, %v119_v38 }
 0x190   :  { %v121_v40 = vsub.f32 1.5, %v120_v39 }
 0x191   :  { %v562_v41 = vpop.eup %561 }
 0x192   :  { %v122_v42 = vmul.f32 %v560_v35, %v121_v40  ;;  %v128_v43 = vmul.f32 %v562_v41, %v116_v36  ;;  %vm134_vm6 = vweird.f32 %v562_v41 }
 0x193   :  { %vm135_vm8 = vmor %vm133_vm7, %vm134_vm6 }
 0x194   :  { %v126_v45 = vsel %vm125_vm5, %v560_v35, %v122_v42  ;;  %v129_v46 = vmul.f32 %v562_v41, %v128_v43 }
 0x195   :  { %v137_v47 = vmul.f32 %v126_v45, %v103_v20 }
 0x196   :  { %v130_v49 = vmul.f32 0.5, %v129_v46 }
 0x197   :  { %v140_v50 = vmul.f32 %v551_v44, %v137_v47 }
 0x198   :  { %v131_v51 = vsub.f32 1.5, %v130_v49 }
 0x199   :  { %v710_v52 = vadd.f32 %v552_v48, %v140_v50 }
 0x19a   :  { %v132_v53 = vmul.f32 %v562_v41, %v131_v51 }
 0x19b   :  { %v713_v54 = vmul.f32 0.70710677, %v710_v52 }
 0x19c   :  { %v136_v55 = vsel %vm135_vm8, %v562_v41, %v132_v53 }
 0x19d   :  { %v138_v56 = vmul.f32 %v136_v55, %v104_v25  ;;  %v149_v57 = vmul.f32 %v713_v54, %v713_v54 }
 0x19f   :  { %v141_v58 = vmul.f32 %v551_v44, %v138_v56  ;;  %v150_v59 = vmin.f32 %v149_v57, 16.0 }
 0x1a1   :  { %v717_v60 = vadd.f32 %v552_v48, %v141_v58  ;;  %v151_v61 = vmul.f32 2.1237322e-06, %v150_v59  ;;  %v162_v62 = vmul.f32 3.8918573e-05, %v150_v59 }
 0x1a3   :  { %v720_v63 = vmul.f32 0.70710677, %v717_v60  ;;  %v152_v0 = vadd.f32 0.00028619796, %v151_v61  ;;  %v163_v1 = vadd.f32 0.001143296, %v162_v62 }
 0x1a5   :  { %v189_v2 = vmul.f32 %v720_v63, %v720_v63  ;;  %v153_v3 = vmul.f32 %v152_v0, %v150_v59  ;;  %v164_v4 = vmul.f32 %v163_v1, %v150_v59 }
 0x1a7   :  { %v190_v5 = vmin.f32 %v189_v2, 16.0  ;;  %v165_v6 = vadd.f32 0.014752088, %v164_v4  ;;  %v154_v9 = vadd.f32 0.0036580483, %v153_v3 }
 0x1a9   :  { %v191_v7 = vmul.f32 2.1237322e-06, %v190_v5  ;;  %v202_v8 = vmul.f32 3.8918573e-05, %v190_v5  ;;  %v166_v10 = vmul.f32 %v165_v6, %v150_v59  ;;  %v155_v16 = vmul.f32 %v154_v9, %v150_v59 }
 0x1ab   :  { %v192_v11 = vadd.f32 0.00028619796, %v191_v7  ;;  %v203_v12 = vadd.f32 0.001143296, %v202_v8  ;;  %v167_v13 = vadd.f32 0.112945676, %v166_v10 }
 0x1ac   :  { %v156_v23 = vadd.f32 0.05243302, %v155_v16  ;;  %v145_v7 = vmul.f32 0.5, %v710_v52  ;;  %v146_v8 = vmul.f32 0.5, %v717_v60 }
 0x1ad   :  { %v193_v14 = vmul.f32 %v192_v11, %v190_v5  ;;  %v204_v15 = vmul.f32 %v203_v12, %v190_v5  ;;  %v168_v18 = vmul.f32 %v167_v13, %v150_v59  ;;  %v553_v13 = vld [vmem:[#allocation4 + $0x3] ss:$0 sm:$0xff] }
 0x1ae   :  { %v157_v29 = vmul.f32 %v156_v23, %v150_v59 }
 0x1af   :  { %v194_v19 = vadd.f32 0.0036580483, %v193_v14  ;;  %v205_v20 = vadd.f32 0.014752088, %v204_v15  ;;  %v169_v21 = vadd.f32 0.4994258, %v168_v18 }
 0x1b0   :  { %v158_v33 = vadd.f32 0.18741608, %v157_v29 }
 0x1b1   :  { %v206_v22 = vmul.f32 %v205_v20, %v190_v5  ;;  %v170_v24 = vmul.f32 %v169_v21, %v150_v59  ;;  %v195_v25 = vmul.f32 %v194_v19, %v190_v5 }
 0x1b2   :  { %v159_v38 = vmul.f32 %v158_v33, %v150_v59 }
 0x1b3   :  { %v207_v26 = vadd.f32 0.112945676, %v206_v22  ;;  %v171_v27 = vadd.f32 1.0, %v170_v24  ;;  %v196_v30 = vadd.f32 0.05243302, %v195_v25 }
 0x1b4   :  { %v160_v44 = vadd.f32 1.1283791, %v159_v38 }
 0x1b5   :  { %v208_v28 = vmul.f32 %v207_v26, %v190_v5  ;;  %563 = vrcp.f32 %v171_v27  ;;  %v197_v34 = vmul.f32 %v196_v30, %v190_v5  ;;  %v183_v41 = vand.u32 2147483648, %v171_v27  ;;  %v544_v30 = vld [vmem:[#allocation2 + $0x8] sm:$0xff] }
 0x1b6   :  { %v181_v43 = vand.u32 2147483647, %v171_v27  ;;  %vm177_vm10 = vweird.f32 %v171_v27  ;;  %v161_v51 = vmul.f32 %v160_v44, %v713_v54  ;;  %439 = vmatpush.bf16.msra.mxu2 %v544_v30  ;;  %v554_v44 = vld [vmem:[#allocation4 + $0x4] ss:$0 sm:$0xff] }
 0x1b7   :  { %v209_v31 = vadd.f32 0.4994258, %v208_v28  ;;  %v198_v40 = vadd.f32 0.18741608, %v197_v34  ;;  %v184_v48 = vor.u32 1.1754944e-38, %v183_v41 }
 0x1b8   :  { %vm182_vm12 = vcmp.eq.f32.partialorder %v181_v43, 8.507059e+37 }
 0x1b9   :  { %v210_v32 = vmul.f32 %v209_v31, %v190_v5  ;;  %v199_v47 = vmul.f32 %v198_v40, %v190_v5 }
 0x1bb   :  { %v211_v35 = vadd.f32 1.0, %v210_v32  ;;  %v564_v36 = vpop.eup %563  ;;  %v200_v56 = vadd.f32 1.1283791, %v199_v47  ;;  %v543_v32 = vld [vmem:[#allocation2] sm:$0xff] }
 0x1bc   :  { %v173_v37 = vmul.f32 %v564_v36, %v171_v27  ;;  %vm178_vm9 = vweird.f32 %v564_v36  ;;  %440 = vmatpush.bf16.msra.mxu2 %v543_v32 }
 0x1bd   :  { %565 = vrcp.f32 %v211_v35  ;;  %vm179_vm11 = vmor %vm177_vm10, %vm178_vm9  ;;  %v223_v57 = vand.u32 2147483648, %v211_v35  ;;  %v221_v61 = vand.u32 2147483647, %v211_v35  ;;  %vm217_vm14 = vweird.f32 %v211_v35 }
 0x1be   :  { %v174_v39 = vsub.f32 1.0, %v173_v37  ;;  %v201_v2 = vmul.f32 %v200_v56, %v720_v63 }
 0x1bf   :  { %v224_v0 = vor.u32 1.1754944e-38, %v223_v57  ;;  %vm222_vm0 = vcmp.eq.f32.partialorder %v221_v61, 8.507059e+37 }
 0x1c0   :  { %v175_v42 = vmul.f32 %v564_v36, %v174_v39 }
 0x1c2   :  { %v176_v46 = vadd.f32 %v564_v36, %v175_v42 }
 0x1c3   :  { %v566_v45 = vpop.eup %565 }
 0x1c4   :  { %v213_v49 = vmul.f32 %v566_v45, %v211_v35  ;;  %v180_v50 = vsel %vm179_vm11, %v564_v36, %v176_v46  ;;  %vm218_vm13 = vweird.f32 %v566_v45 }
 0x1c5   :  { %v185_v53 = vsel %vm182_vm12, %v184_v48, %v180_v50  ;;  %vm219_vm15 = vmor %vm217_vm14, %vm218_vm13  ;;  %v555_v48 = vld [vmem:[#allocation4 + $0x5] ss:$0 sm:$0xff] }
 0x1c6   :  { %v214_v55 = vsub.f32 1.0, %v213_v49  ;;  %v186_v58 = vmul.f32 %v185_v53, %v161_v51 }
 0x1c8   :  { %v215_v59 = vmul.f32 %v566_v45, %v214_v55  ;;  %v516_v1 = vclamps-f32 %v186_v58, 1.0 }
 0x1ca   :  { %v216_v62 = vadd.f32 %v566_v45, %v215_v59  ;;  %v229_v6 = vadd.f32 1.0, %v516_v1 }
 0x1cc   :  { %v220_v3 = vsel %vm219_vm15, %v566_v45, %v216_v62  ;;  %v231_v10 = vmul.f32 %v229_v6, %v145_v7 }
 0x1cd   :  { %v225_v4 = vsel %vm222_vm0, %v224_v0, %v220_v3 }
 0x1ce   :  { %v226_v5 = vmul.f32 %v225_v4, %v201_v2 }
 0x1d0   :  { %v517_v54 = vclamps-f32 %v226_v5, 1.0 }
 0x1d2   :  { %v230_v9 = vadd.f32 1.0, %v517_v54 }
 0x1d4   :  { %v232_v11 = vmul.f32 %v230_v9, %v146_v8 }
 0x1d6   :  { %v233_v12 = vpack.c.bf16 %v232_v11, %v231_v10 }
 0x1d8   :  { %526 = vmatmul.msk.bf16.vlgmr.msra.gmra.mxu1 %vm87_vm1, %v233_v12 }
 0x255   :  { %v264_v14 = vpop.f32.mrf.mxu1 }
 0x256   :  { %v265_v15 = vadd.f32 %v553_v13, %v264_v14 }
 0x258   :  { %v271_v63 = vsel %vm87_vm1, %v265_v15, 0.0 }
 0x259   :  { %272 = vadd.xlane.f32.xlu2 %v271_v63 }
 0x25d   :  { %v266_v16 = vpop.f32.mrf.mxu1 }
 0x25e   :  { %v267_v18 = vadd.f32 %v553_v13, %v266_v16 }
 0x260   :  { %v274_v19 = vsel %vm87_vm1, %v267_v18, 0.0 }
 0x261   :  { %275 = vadd.xlane.f32.xlu2 %v274_v19 }
 0x2cc   :  { %v273_v52 = vpop.xlane.xlu2 %272 }
 0x2cd   :  { %v277_v60 = vmul.f32 %v273_v52, %v696_v17 }
 0x2cf   :  { %v279_v20 = vsub.f32 %v265_v15, %v277_v60 }
 0x2d1   :  { %v281_v21 = vmul.f32 %v279_v20, %v279_v20 }
 0x2d3   :  { %v283_v22 = vsel %vm87_vm1, %v281_v21, 0.0 }
 0x2d4   :  { %284 = vadd.xlane.f32.xlu0 %v283_v22  ;;  %v276_v23 = vpop.xlane.xlu2 %275 }
 0x2d5   :  { %v278_v24 = vmul.f32 %v276_v23, %v696_v17 }
 0x2d7   :  { %v280_v25 = vsub.f32 %v267_v18, %v278_v24 }
 0x2d9   :  { %v282_v26 = vmul.f32 %v280_v25, %v280_v25 }
 0x2db   :  { %v286_v27 = vsel %vm87_vm1, %v282_v26, 0.0 }
 0x2dc   :  { %287 = vadd.xlane.f32.xlu1 %v286_v27 }
 0x347   :  { %v285_v28 = vpop.xlane.xlu0 %284 }
 0x348   :  { %v289_v29 = vmul.f32 %v285_v28, %v696_v17 }
 0x34a   :  { %v291_v31 = vadd.f32 1e-05, %v289_v29 }
 0x34c   :  { %567 = vrsqrt.f32 %v291_v31  ;;  %vm299_vm3 = vweird.f32 %v291_v31 }
 0x34f   :  { %v288_v33 = vpop.xlane.xlu1 %287 }
 0x350   :  { %v290_v34 = vmul.f32 %v288_v33, %v696_v17 }
 0x352   :  { %v568_v35 = vpop.eup %567  ;;  %v292_v36 = vadd.f32 1e-05, %v290_v34 }
 0x353   :  { %v294_v37 = vmul.f32 %v568_v35, %v291_v31  ;;  %vm300_vm2 = vweird.f32 %v568_v35 }
 0x354   :  { %569 = vrsqrt.f32 %v292_v36  ;;  %vm301_vm4 = vmor %vm299_vm3, %vm300_vm2  ;;  %vm309_vm6 = vweird.f32 %v292_v36 }
 0x355   :  { %v295_v38 = vmul.f32 %v568_v35, %v294_v37 }
 0x357   :  { %v296_v39 = vmul.f32 0.5, %v295_v38 }
 0x359   :  { %v297_v40 = vsub.f32 1.5, %v296_v39 }
 0x35a   :  { %v570_v41 = vpop.eup %569 }
 0x35b   :  { %v298_v42 = vmul.f32 %v568_v35, %v297_v40  ;;  %v304_v43 = vmul.f32 %v570_v41, %v292_v36  ;;  %vm310_vm5 = vweird.f32 %v570_v41 }
 0x35c   :  { %vm311_vm7 = vmor %vm309_vm6, %vm310_vm5 }
 0x35d   :  { %v302_v45 = vsel %vm301_vm4, %v568_v35, %v298_v42  ;;  %v305_v46 = vmul.f32 %v570_v41, %v304_v43 }
 0x35e   :  { %v313_v47 = vmul.f32 %v302_v45, %v279_v20 }
 0x35f   :  { %v306_v49 = vmul.f32 0.5, %v305_v46 }
 0x360   :  { %v316_v17 = vmul.f32 %v554_v44, %v313_v47 }
 0x361   :  { %v307_v50 = vsub.f32 1.5, %v306_v49 }
 0x362   :  { %v737_v51 = vadd.f32 %v555_v48, %v316_v17 }
 0x363   :  { %v308_v53 = vmul.f32 %v570_v41, %v307_v50 }
 0x364   :  { %v740_v55 = vmul.f32 0.70710677, %v737_v51 }
 0x365   :  { %v312_v56 = vsel %vm311_vm7, %v570_v41, %v308_v53 }
 0x366   :  { %v314_v57 = vmul.f32 %v312_v56, %v280_v25  ;;  %v325_v58 = vmul.f32 %v740_v55, %v740_v55 }
 0x368   :  { %v317_v59 = vmul.f32 %v554_v44, %v314_v57  ;;  %v326_v61 = vmin.f32 %v325_v58, 16.0 }
 0x36a   :  { %v744_v62 = vadd.f32 %v555_v48, %v317_v59  ;;  %v327_v0 = vmul.f32 2.1237322e-06, %v326_v61  ;;  %v338_v1 = vmul.f32 3.8918573e-05, %v326_v61 }
 0x36c   :  { %v747_v2 = vmul.f32 0.70710677, %v744_v62  ;;  %v328_v3 = vadd.f32 0.00028619796, %v327_v0  ;;  %v339_v4 = vadd.f32 0.001143296, %v338_v1 }
 0x36e   :  { %v365_v5 = vmul.f32 %v747_v2, %v747_v2  ;;  %v329_v54 = vmul.f32 %v328_v3, %v326_v61  ;;  %v340_v6 = vmul.f32 %v339_v4, %v326_v61 }
 0x370   :  { %v366_v7 = vmin.f32 %v365_v5, 16.0  ;;  %v341_v8 = vadd.f32 0.014752088, %v340_v6  ;;  %v330_v11 = vadd.f32 0.0036580483, %v329_v54 }
 0x372   :  { %v367_v9 = vmul.f32 2.1237322e-06, %v366_v7  ;;  %v378_v10 = vmul.f32 3.8918573e-05, %v366_v7  ;;  %v342_v12 = vmul.f32 %v341_v8, %v326_v61  ;;  %v331_v18 = vmul.f32 %v330_v11, %v326_v61 }
 0x373   :  { %v321_v8 = vmul.f32 0.5, %v737_v51 }
 0x374   :  { %v368_v13 = vadd.f32 0.00028619796, %v367_v9  ;;  %v379_v14 = vadd.f32 0.001143296, %v378_v10  ;;  %v343_v15 = vadd.f32 0.112945676, %v342_v12 }
 0x375   :  { %v332_v22 = vadd.f32 0.05243302, %v331_v18  ;;  %v322_v9 = vmul.f32 0.5, %v744_v62 }
 0x376   :  { %v369_v63 = vmul.f32 %v368_v13, %v366_v7  ;;  %v380_v16 = vmul.f32 %v379_v14, %v366_v7  ;;  %v344_v19 = vmul.f32 %v343_v15, %v326_v61  ;;  %v447_v15 = vlaneseq }
 0x377   :  { %v333_v28 = vmul.f32 %v332_v22, %v326_v61 }
 0x378   :  { %v370_v52 = vadd.f32 0.0036580483, %v369_v63  ;;  %v381_v60 = vadd.f32 0.014752088, %v380_v16  ;;  %v345_v20 = vadd.f32 0.4994258, %v344_v19 }
 0x379   :  { %v334_v32 = vadd.f32 0.18741608, %v333_v28  ;;  %v448_v18 = vand.u32 127, %v447_v15 }
 0x37a   :  { %v382_v21 = vmul.f32 %v381_v60, %v366_v7  ;;  %v346_v23 = vmul.f32 %v345_v20, %v326_v61  ;;  %v371_v24 = vmul.f32 %v370_v52, %v366_v7 }
 0x37b   :  { %v335_v37 = vmul.f32 %v334_v32, %v326_v61  ;;  %vm449_vm0 = vcmp.ge.s32.totalorder %v448_v18, 4  ;;  %vm450_vm2 = vcmp.lt.s32.totalorder %v448_v18, 8  ;;  %vm453_vm4 = vcmp.lt.s32.totalorder %v448_v18, 10 }
 0x37c   :  { %v383_v25 = vadd.f32 0.112945676, %v382_v21  ;;  %v347_v26 = vadd.f32 1.0, %v346_v23  ;;  %v372_v29 = vadd.f32 0.05243302, %v371_v24  ;;  %vm759_vm3 = vmand %vm449_vm0, %vm450_vm2 }
 0x37d   :  { %v336_v43 = vadd.f32 1.1283791, %v335_v37 }
 0x37e   :  { %v384_v27 = vmul.f32 %v383_v25, %v366_v7  ;;  %571 = vrcp.f32 %v347_v26  ;;  %v373_v33 = vmul.f32 %v372_v29, %v366_v7  ;;  %v359_v40 = vand.u32 2147483648, %v347_v26 }
 0x37f   :  { %v357_v42 = vand.u32 2147483647, %v347_v26  ;;  %vm353_vm9 = vweird.f32 %v347_v26  ;;  %v337_v17 = vmul.f32 %v336_v43, %v740_v55 }
 0x380   :  { %v385_v30 = vadd.f32 0.4994258, %v384_v27  ;;  %v374_v39 = vadd.f32 0.18741608, %v373_v33  ;;  %v360_v47 = vor.u32 1.1754944e-38, %v359_v40 }
 0x381   :  { %vm358_vm11 = vcmp.eq.f32.partialorder %v357_v42, 8.507059e+37 }
 0x382   :  { %v386_v31 = vmul.f32 %v385_v30, %v366_v7  ;;  %v375_v46 = vmul.f32 %v374_v39, %v366_v7 }
 0x384   :  { %v387_v34 = vadd.f32 1.0, %v386_v31  ;;  %v572_v35 = vpop.eup %571  ;;  %v376_v56 = vadd.f32 1.1283791, %v375_v46 }
 0x385   :  { %v349_v36 = vmul.f32 %v572_v35, %v347_v26  ;;  %vm354_vm8 = vweird.f32 %v572_v35 }
 0x386   :  { %573 = vrcp.f32 %v387_v34  ;;  %vm355_vm10 = vmor %vm353_vm9, %vm354_vm8  ;;  %v399_v57 = vand.u32 2147483648, %v387_v34  ;;  %v397_v61 = vand.u32 2147483647, %v387_v34  ;;  %vm393_vm13 = vweird.f32 %v387_v34 }
 0x387   :  { %v350_v38 = vsub.f32 1.0, %v349_v36  ;;  %v377_v4 = vmul.f32 %v376_v56, %v747_v2  ;;  %v556_v2 = vld [vmem:[%s790_s5] ss:$0 sm:$0xff] }
 0x388   :  { %v400_v1 = vor.u32 1.1754944e-38, %v399_v57  ;;  %vm398_vm15 = vcmp.eq.f32.partialorder %v397_v61, 8.507059e+37 }
 0x389   :  { %v351_v41 = vmul.f32 %v572_v35, %v350_v38 }
 0x38b   :  { %v352_v45 = vadd.f32 %v572_v35, %v351_v41 }
 0x38c   :  { %v574_v44 = vpop.eup %573 }
 0x38d   :  { %v389_v48 = vmul.f32 %v574_v44, %v387_v34  ;;  %v356_v49 = vsel %vm355_vm10, %v572_v35, %v352_v45  ;;  %vm394_vm12 = vweird.f32 %v574_v44 }
 0x38e   :  { %v361_v50 = vsel %vm358_vm11, %v360_v47, %v356_v49  ;;  %vm395_vm14 = vmor %vm393_vm13, %vm394_vm12 }
 0x38f   :  { %v390_v53 = vsub.f32 1.0, %v389_v48  ;;  %v362_v58 = vmul.f32 %v361_v50, %v337_v17 }
 0x391   :  { %v391_v59 = vmul.f32 %v574_v44, %v390_v53  ;;  %v527_v3 = vclamps-f32 %v362_v58, 1.0 }
 0x393   :  { %v392_v0 = vadd.f32 %v574_v44, %v391_v59  ;;  %v405_v7 = vadd.f32 1.0, %v527_v3 }
 0x395   :  { %v396_v5 = vsel %vm395_vm14, %v574_v44, %v392_v0  ;;  %v407_v11 = vmul.f32 %v405_v7, %v321_v8 }
 0x396   :  { %v401_v54 = vsel %vm398_vm15, %v400_v1, %v396_v5 }
 0x397   :  { %v402_v6 = vmul.f32 %v401_v54, %v377_v4 }
 0x399   :  { %v528_v55 = vclamps-f32 %v402_v6, 1.0 }
 0x39b   :  { %v406_v10 = vadd.f32 1.0, %v528_v55 }
 0x39d   :  { %v408_v12 = vmul.f32 %v406_v10, %v322_v9 }
 0x39f   :  { %v409_v13 = vpack.c.bf16 %v408_v12, %v407_v11 }
 0x3a1   :  { %537 = vmatmul.msk.bf16.vlgmr.msra.gmra.mxu2 %vm87_vm1, %v409_v13  ;;  %vm452_vm1 = vcmp.ge.s32.totalorder %v448_v18, 8 }
 0x3a2   :  { %vm767_vm6 = vmand %vm452_vm1, %vm453_vm4 }
 0x424   :  { %v442_v14 = vpop.f32.mrf.mxu2 }
 0x425   :  { %v443_v63 = vadd.f32 %v556_v2, %v442_v14 }
 0x427   :  { %v538_v16 = vmul.f32 -1.442695, %v443_v63  ;;  %v455_v21 = vsel %vm759_vm3, %v443_v63, 0.0 }
 0x428   :  { %v457_v22 = vmul.f32 1.442695, %v455_v21 }
 0x429   :  { %575 = vpow2.f32 %v538_v16 }
 0x42c   :  { %v444_v51 = vpop.f32.mrf.mxu2 }
 0x42d   :  { %v445_v62 = vadd.f32 %v556_v2, %v444_v51 }
 0x42f   :  { %v576_v19 = vpop.eup %575  ;;  %v539_v60 = vmul.f32 -1.442695, %v445_v62  ;;  %v456_v27 = vsel %vm759_vm3, %v445_v62, 0.0 }
 0x430   :  { %v467_v20 = vadd.f32 1.0, %v576_v19  ;;  %v459_v32 = vmul.f32 1.442695, %v456_v27 }
 0x431   :  { %577 = vpow2.f32 %v539_v60 }
 0x432   :  { %579 = vrcp.f32 %v467_v20  ;;  %v480_v29 = vand.u32 2147483648, %v467_v20  ;;  %v478_v31 = vand.u32 2147483647, %v467_v20  ;;  %vm474_vm7 = vweird.f32 %v467_v20 }
 0x433   :  { %581 = vpow2.f32 %v457_v22 }
 0x434   :  { %v481_v37 = vor.u32 1.1754944e-38, %v480_v29  ;;  %vm479_vm9 = vcmp.eq.f32.partialorder %v478_v31, 8.507059e+37 }
 0x437   :  { %v578_v23 = vpop.eup %577 }
 0x438   :  { %v580_v24 = vpop.eup %579  ;;  %v468_v25 = vadd.f32 1.0, %v578_v23 }
 0x439   :  { %v470_v26 = vmul.f32 %v580_v24, %v467_v20  ;;  %vm475_vm5 = vweird.f32 %v580_v24  ;;  %v582_v33 = vpop.eup %581 }
 0x43a   :  { %583 = vrcp.f32 %v468_v25  ;;  %vm476_vm8 = vmor %vm474_vm7, %vm475_vm5  ;;  %v499_v41 = vsel %vm759_vm3, %v582_v33, %v443_v63  ;;  %v495_v44 = vand.u32 2147483648, %v468_v25  ;;  %v493_v46 = vand.u32 2147483647, %v468_v25 }
 0x43b   :  { %v471_v28 = vsub.f32 1.0, %v470_v26  ;;  %585 = vpow2.f32 %v459_v32  ;;  %vm489_vm11 = vweird.f32 %v468_v25 }
 0x43c   :  { %v496_v49 = vor.u32 1.1754944e-38, %v495_v44  ;;  %vm494_vm13 = vcmp.eq.f32.partialorder %v493_v46, 8.507059e+37 }
 0x43d   :  { %v472_v30 = vmul.f32 %v580_v24, %v471_v28 }
 0x43f   :  { %v473_v35 = vadd.f32 %v580_v24, %v472_v30 }
 0x440   :  { %v584_v36 = vpop.eup %583 }
 0x441   :  { %v477_v38 = vsel %vm476_vm8, %v580_v24, %v473_v35  ;;  %v485_v39 = vmul.f32 %v584_v36, %v468_v25  ;;  %vm490_vm10 = vweird.f32 %v584_v36  ;;  %v586_v47 = vpop.eup %585 }
 0x442   :  { %v482_v40 = vsel %vm479_vm9, %v481_v37, %v477_v38  ;;  %vm491_vm12 = vmor %vm489_vm11, %vm490_vm10  ;;  %v500_v53 = vsel %vm759_vm3, %v586_v47, %v445_v62 }
 0x443   :  { %v501_v42 = vsel %vm767_vm6, %v482_v40, %v499_v41  ;;  %v486_v43 = vsub.f32 1.0, %v485_v39 }
 0x444   :  { %503 = vst [vmem:[%s791_s6] sm:$0xff] %v501_v42 }
 0x445   :  { %v487_v45 = vmul.f32 %v584_v36, %v486_v43 }
 0x447   :  { %v488_v48 = vadd.f32 %v584_v36, %v487_v45 }
 0x449   :  { %v492_v17 = vsel %vm491_vm12, %v584_v36, %v488_v48 }
 0x44a   :  { %v497_v50 = vsel %vm494_vm13, %v496_v49, %v492_v17 }
 0x44b   :  { %v502_v56 = vsel %vm767_vm6, %v497_v50, %v500_v53 }
 0x44c   :  { %504 = vst [vmem:[%s791_s6 + $0x8] sm:$0xff] %v502_v56 }
 0x44d   :  { %509 = vsyncpa [#allocation3], 1 }
 0x44e   :  { %510 = vsyncpa [#allocation5], 1 }

</bundles_post_ra>
